<compile_context>
chip_gen: v7x
topology: tpu7x:2x2x1
jax: 0.10.0
libtpu: 0.0.40
codegen_flags: <defaults>
</compile_context>

<pallas_src>
import jax
import jax.numpy as jnp
from jax.experimental import pallas as pl
from jax.experimental.pallas import tpu as pltpu

MAX_PIX_TILE = 2048   # pixels per grid step (lane axis), multiple of 128
MAX_K_TILE = 256      # gaussians resident per step; bounds (K_TILE x PIX_TILE) temps
NUM_BASIS = 8         # basis rows: [u^2, u*v, v^2, u, v, 1, 0, 0]


def _round_up(x, m):
    return ((x + m - 1) // m) * m


def _pick_pix_tile(p_pad):
    """Largest 128-multiple tile that divides p_pad, capped so the 'parallel'
    pixel axis has >= 2 grid steps (keeps both v7x TensorCores busy)."""
    cap = min(MAX_PIX_TILE, p_pad)
    if p_pad >= 256:
        cap = min(cap, p_pad // 2)
    cap = max((cap // 128) * 128, 128)
    t = cap
    while t > 128 and p_pad % t:
        t -= 128
    return t


def _make_splat_kernel(H, W, pix_tile, k_tile):
    inv_w = 1.0 / float(W)
    inv_h = 1.0 / float(H)
    Wf = float(W)

    def splat_kernel(nact_ref, coef_ref, col_ref, o_ref, basis_ref):
        """Accumulate one gaussian tile into one pixel tile.

        nact_ref : SMEM (1,) int32    number of active gaussians (scalar prefetch)
        coef_ref : (K_TILE, 8) f32    expanded quadratic coeffs [a, b, c, D, E, F, 0, 0]
        col_ref  : (3, K_TILE) bf16   opacity-premultiplied RGB
        o_ref    : (3, PIX_TILE) f32  accumulated RGB (resident across the K grid axis)
        basis_ref: VMEM (8, PIX_TILE) f32 pixel polynomial basis (built at k == 0)
        """
        i = pl.program_id(0)
        k = pl.program_id(1)

        @pl.when(k == 0)
        def _init():
            o_ref[...] = jnp.zeros_like(o_ref)
            # Pixel coordinates generated in-kernel, basis built ONCE per pixel
            # tile and reused by every gaussian tile via the persistent scratch.
            lane = jax.lax.broadcasted_iota(jnp.int32, (1, pix_tile), 1)
            p = (lane + i * pix_tile).astype(jnp.float32)        # flat pixel index
            # row = p // W, col = p % W via float math (exact up to ~2M pixels)
            row = jnp.floor((p + 0.5) * inv_w)
            col = p - row * Wf
            # image-centered coordinates (|u|,|v| <= 0.5) mitigate cancellation
            # in the expanded polynomial for narrow gaussians.
            u = (col + 0.5) * inv_w - 0.5
            v = (row + 0.5) * inv_h - 0.5
            basis_ref[0:1, :] = u * u
            basis_ref[1:2, :] = u * v
            basis_ref[2:3, :] = v * v
            basis_ref[3:4, :] = u
            basis_ref[4:5, :] = v
            basis_ref[5:6, :] = jnp.ones_like(u)
            basis_ref[6:8, :] = jnp.zeros((2, pix_tile), jnp.float32)

        # Skip gaussian tiles that are entirely inactive under the progressive
        # schedule (shapes unchanged -> one compiled kernel; cost ~ active fraction).
        @pl.when(k * k_tile < nact_ref[0])
        def _compute():
            # q = -0.5 * d^T Sigma^-1 d evaluated on the MXU:
            #   (K_TILE, 8) @ (8, PIX_TILE), f32 operands & accumulation.
            q = jnp.dot(coef_ref[...], basis_ref[...],
                        preferred_element_type=jnp.float32)
            w = jnp.exp(q).astype(jnp.bfloat16)                  # EUP; bf16 feed for MXU
            # (3, K_TILE) @ (K_TILE, PIX_TILE) -> (3, PIX_TILE), f32 accumulation
            o_ref[...] += jnp.dot(col_ref[...], w,
                                  preferred_element_type=jnp.float32)

    return splat_kernel


def render_pallas(coeffs, colors_pm, num_active_g, H, W):
    """coeffs: (K, 8) f32, colors_pm: (3, K) f32 -> (3, H, W) f32."""
    K = coeffs.shape[0]
    P = H * W
    # float row/col decomposition in-kernel is exact up to ~2M pixels.
    # TODO(synk): switch to a 2D (row-tile, col-tile) pixel grid for larger images.
    assert P <= (1 << 21), "use a 2D pixel grid for images above ~2M pixels"

    p_pad = _round_up(P, 128)          # overflow pixels render harmlessly, sliced off
    pix_tile = _pick_pix_tile(p_pad)

    # Gaussian tiling: keep all K resident when small, otherwise tile by MAX_K_TILE.
    if K <= MAX_K_TILE:
        k_tile = _round_up(max(K, 1), 8)
    else:
        k_tile = MAX_K_TILE
    k_pad = _round_up(K, k_tile)
    if k_pad != K:
        pad = k_pad - K
        # zero coeffs + zero premultiplied colors => padded gaussians are exact no-ops
        coeffs = jnp.concatenate(
            [coeffs, jnp.zeros((pad, NUM_BASIS), coeffs.dtype)], axis=0)
        colors_pm = jnp.concatenate(
            [colors_pm, jnp.zeros((3, pad), colors_pm.dtype)], axis=1)
    n_k = k_pad // k_tile

    kernel = _make_splat_kernel(H, W, pix_tile, k_tile)
    nact = jnp.array([num_active_g], dtype=jnp.int32)

    out = pl.pallas_call(
        kernel,
        out_shape=jax.ShapeDtypeStruct((3, p_pad), jnp.float32),
        grid_spec=pltpu.PrefetchScalarGridSpec(
            num_scalar_prefetch=1,
            grid=(p_pad // pix_tile, n_k),
            in_specs=[
                pl.BlockSpec((k_tile, NUM_BASIS), lambda i, k, n: (k, 0)),  # coeffs tile
                pl.BlockSpec((3, k_tile), lambda i, k, n: (0, k)),          # premul colors
            ],
            out_specs=pl.BlockSpec((3, pix_tile), lambda i, k, n: (0, i)),
            scratch_shapes=[pltpu.VMEM((NUM_BASIS, pix_tile), jnp.float32)],
        ),
        compiler_params=pltpu.CompilerParams(
            dimension_semantics=("parallel", "arbitrary")),
    )(nact, coeffs, colors_pm.astype(jnp.bfloat16))
    return out[:, :P].reshape(3, H, W)


class ProgressiveGaussianSplatterJAX:
    """JAX/Pallas port of ProgressiveGaussianSplatter (deterministic synthetic params)."""

    PARAMS_PER_GAUSSIAN = 9  # xy(2) + log_scale(2) + rot(1) + rgb(3) + opacity(1)

    def __init__(self, num_features, feature_dim, gaussians_per_feature, key):
        self.num_features = num_features
        self.feature_dim = feature_dim
        self.gaussians_per_feature = gaussians_per_feature
        self.color_range = (0.0, 1.0)
        self.log_scale_range = (-7.0, 1.0)

        k1, k2, k3 = jax.random.split(key, 3)
        # nn.Parameter(torch.randn(1, num_features, feature_dim))
        self.feature = jax.random.normal(
            k1, (1, num_features, feature_dim), dtype=jnp.float32)
        out_dim = gaussians_per_feature * self.PARAMS_PER_GAUSSIAN
        # GaussianSplatting2D projection head (deterministic init, not a checkpoint)
        self.proj_w = 0.1 * jax.random.normal(k2, (feature_dim, out_dim), dtype=jnp.float32)
        self.proj_b = 0.1 * jax.random.normal(k3, (out_dim,), dtype=jnp.float32)

    def _decode(self, raw):
        """raw: (K, 9) -> expanded polynomial coeffs (K, 8), premultiplied colors (3, K).

        q = -0.5 * d^T Sigma^-1 d  (d = pixel - mu), expanded in image-centered
        coordinates u = px - 0.5, v = py - 0.5 as
            q = a*u^2 + b*u*v + c*v^2 + D*u + E*v + F
        so the kernel evaluates it as one MXU matmul against [u^2,u*v,v^2,u,v,1,0,0].
        """
        xy = jax.nn.sigmoid(raw[:, 0:2])                                 # centers in [0,1]^2
        lo, hi = self.log_scale_range
        log_s = lo + jax.nn.sigmoid(raw[:, 2:4]) * (hi - lo)             # log-scale in (-7, 1)
        sx, sy = jnp.exp(log_s[:, 0]), jnp.exp(log_s[:, 1])
        theta = raw[:, 4]
        clo, chi = self.color_range
        color = clo + jax.nn.sigmoid(raw[:, 5:8]) * (chi - clo)          # (K, 3) in (0,1)
        opacity = jax.nn.sigmoid(raw[:, 8:9])                            # (K, 1)

        cos_t, sin_t = jnp.cos(theta), jnp.sin(theta)
        inv_sx2, inv_sy2 = 1.0 / (sx * sx), 1.0 / (sy * sy)
        # Sigma^{-1} = R diag(1/sx^2, 1/sy^2) R^T ; d^T Sigma^-1 d = A dx^2 + 2 B dx dy + C dy^2
        A = cos_t * cos_t * inv_sx2 + sin_t * sin_t * inv_sy2
        C = sin_t * sin_t * inv_sx2 + cos_t * cos_t * inv_sy2
        B = cos_t * sin_t * (inv_sx2 - inv_sy2)
        # fold the -0.5 and the literal 2.0 into the coefficients
        a, b, c = -0.5 * A, -B, -0.5 * C
        # recenter gaussian means to match the kernel's centered pixel coords
        mx = xy[:, 0] - 0.5
        my = xy[:, 1] - 0.5
        D = -2.0 * a * mx - b * my
        E = -b * mx - 2.0 * c * my
        F = a * mx * mx + b * mx * my + c * my * my
        zeros = jnp.zeros_like(a)
        coeffs = jnp.stack([a, b, c, D, E, F, zeros, zeros], axis=-1)    # (K, 8)
        colors_pm = (opacity * color).T                                  # (3, K)
        return coeffs.astype(jnp.float32), colors_pm.astype(jnp.float32)

    def __call__(self, num_active_features=None, size=None):
        if num_active_features is None:
            num_active_features = self.num_features
        else:
            num_active_features = min(num_active_features, self.num_features)
        if size is None:
            size = (16, 16)
        H, W = size

        # Run the head on ALL features at the fixed K = num_features * G; inactive
        # gaussians are (a) zeroed in premultiplied color (exact no-op in additive
        # blending) and (b) skipped tile-wise inside the kernel via scalar prefetch.
        raw = self.feature @ self.proj_w + self.proj_b                   # (1, N, G*9)
        K = self.num_features * self.gaussians_per_feature
        raw = raw.reshape(K, self.PARAMS_PER_GAUSSIAN)

        coeffs, colors_pm = self._decode(raw)
        num_active_g = int(num_active_features) * self.gaussians_per_feature
        active = (jnp.arange(K) < num_active_g).astype(jnp.float32)      # (K,)
        colors_pm = colors_pm * active[None, :]

        img = render_pallas(coeffs, colors_pm, num_active_g, H, W)       # (3, H, W)
        return img[None]                                                 # (1, 3, H, W)  NCHW


if __name__ == "__main__":
    key = jax.random.PRNGKey(0)
    model = ProgressiveGaussianSplatterJAX(
        num_features=8, feature_dim=32, gaussians_per_feature=4, key=key)

    # progressive call: only 6 of 8 features active, 16x16 render target
    img = model(num_active_features=6, size=(16, 16))
    img = jax.block_until_ready(img)

    assert img.shape == (1, 3, 16, 16), img.shape
    assert img.dtype == jnp.float32
    assert bool(jnp.all(jnp.isfinite(img)))
    print("KERNEL_OK")
</pallas_src>

<mosaic_0001>
module attributes {stable_mosaic.version = 11 : i64} {
  func.func @splat_kernel(%arg0: i32, %arg1: i32, %arg2: memref<1xi32, #tpu.memory_space<smem>>, %arg3: memref<32x8xf32, #tpu.memory_space<vmem>>, %arg4: memref<3x32xbf16, #tpu.memory_space<vmem>>, %arg5: memref<3x128xf32, #tpu.memory_space<vmem>>, %arg6: memref<8x128xf32, #tpu.memory_space<vmem>>) attributes {dimension_semantics = [#tpu.dimension_semantics<parallel>, #tpu.dimension_semantics<arbitrary>], iteration_bounds = array<i64: 2, 1>, scalar_prefetch = 1 : i64, scratch_operands = 1 : i64, tpu.core_type = #tpu.core_type<tc>, window_params = [{transform_indices = @transform_0, window_bounds = array<i64: 32, 8>}, {transform_indices = @transform_1, window_bounds = array<i64: 3, 32>}, {transform_indices = @transform_2, window_bounds = array<i64: 3, 128>}]} {
    %c0_i32 = arith.constant 0 : i32
    %0 = arith.cmpi eq, %arg1, %c0_i32 : i32
    %1 = arith.extui %0 : i1 to i32
    %c0_i32_0 = arith.constant 0 : i32
    %2 = arith.cmpi ne, %1, %c0_i32_0 : i32
    scf.if %2 {
      %cst = arith.constant 0.000000e+00 : f32
      %8 = vector.broadcast %cst : f32 to vector<3x128xf32>
      %c0_2 = arith.constant 0 : index
      %c0_3 = arith.constant 0 : index
      %9 = vector.load %arg5[%c0_2, %c0_3] : memref<3x128xf32, #tpu.memory_space<vmem>>, vector<3x128xf32>
      tpu.vector_store %arg5[%c0_2, %c0_3], %8 {strides = array<i32>} : memref<3x128xf32, #tpu.memory_space<vmem>>, vector<3x128xf32>,
      %10 = tpu.iota {dimensions = array<i32: 1>} : vector<1x128xi32>
      %c128_i32 = arith.constant 128 : i32
      %11 = arith.muli %arg0, %c128_i32 : i32
      %12 = vector.broadcast %11 : i32 to vector<1x128xi32>
      %13 = arith.addi %10, %12 : vector<1x128xi32>
      %14 = arith.sitofp %13 : vector<1x128xi32> to vector<1x128xf32>
      %cst_4 = arith.constant 5.000000e-01 : f32
      %15 = vector.broadcast %cst_4 : f32 to vector<1x128xf32>
      %16 = arith.addf %14, %15 : vector<1x128xf32>
      %cst_5 = arith.constant 6.250000e-02 : f32
      %17 = vector.broadcast %cst_5 : f32 to vector<1x128xf32>
      %18 = arith.mulf %16, %17 : vector<1x128xf32>
      %19 = math.floor %18 : vector<1x128xf32>
      %cst_6 = arith.constant 1.600000e+01 : f32
      %20 = vector.broadcast %cst_6 : f32 to vector<1x128xf32>
      %21 = arith.mulf %19, %20 : vector<1x128xf32>
      %22 = arith.subf %14, %21 : vector<1x128xf32>
      %cst_7 = arith.constant 5.000000e-01 : f32
      %23 = vector.broadcast %cst_7 : f32 to vector<1x128xf32>
      %24 = arith.addf %22, %23 : vector<1x128xf32>
      %cst_8 = arith.constant 6.250000e-02 : f32
      %25 = vector.broadcast %cst_8 : f32 to vector<1x128xf32>
      %26 = arith.mulf %24, %25 : vector<1x128xf32>
      %cst_9 = arith.constant 5.000000e-01 : f32
      %27 = vector.broadcast %cst_9 : f32 to vector<1x128xf32>
      %28 = arith.subf %26, %27 : vector<1x128xf32>
      %cst_10 = arith.constant 5.000000e-01 : f32
      %29 = vector.broadcast %cst_10 : f32 to vector<1x128xf32>
      %30 = arith.addf %19, %29 : vector<1x128xf32>
      %cst_11 = arith.constant 6.250000e-02 : f32
      %31 = vector.broadcast %cst_11 : f32 to vector<1x128xf32>
      %32 = arith.mulf %30, %31 : vector<1x128xf32>
      %cst_12 = arith.constant 5.000000e-01 : f32
      %33 = vector.broadcast %cst_12 : f32 to vector<1x128xf32>
      %34 = arith.subf %32, %33 : vector<1x128xf32>
      %35 = arith.mulf %28, %28 : vector<1x128xf32>
      %c0_13 = arith.constant 0 : index
      %c0_14 = arith.constant 0 : index
      %36 = vector.load %arg6[%c0_13, %c0_14] : memref<8x128xf32, #tpu.memory_space<vmem>>, vector<1x128xf32>
      tpu.vector_store %arg6[%c0_13, %c0_14], %35 {strides = array<i32>} : memref<8x128xf32, #tpu.memory_space<vmem>>, vector<1x128xf32>,
      %37 = arith.mulf %28, %34 : vector<1x128xf32>
      %c1 = arith.constant 1 : index
      %c0_15 = arith.constant 0 : index
      %38 = vector.load %arg6[%c1, %c0_15] : memref<8x128xf32, #tpu.memory_space<vmem>>, vector<1x128xf32>
      tpu.vector_store %arg6[%c1, %c0_15], %37 {strides = array<i32>} : memref<8x128xf32, #tpu.memory_space<vmem>>, vector<1x128xf32>,
      %39 = arith.mulf %34, %34 : vector<1x128xf32>
      %c2 = arith.constant 2 : index
      %c0_16 = arith.constant 0 : index
      %40 = vector.load %arg6[%c2, %c0_16] : memref<8x128xf32, #tpu.memory_space<vmem>>, vector<1x128xf32>
      tpu.vector_store %arg6[%c2, %c0_16], %39 {strides = array<i32>} : memref<8x128xf32, #tpu.memory_space<vmem>>, vector<1x128xf32>,
      %c3 = arith.constant 3 : index
      %c0_17 = arith.constant 0 : index
      %41 = vector.load %arg6[%c3, %c0_17] : memref<8x128xf32, #tpu.memory_space<vmem>>, vector<1x128xf32>
      tpu.vector_store %arg6[%c3, %c0_17], %28 {strides = array<i32>} : memref<8x128xf32, #tpu.memory_space<vmem>>, vector<1x128xf32>,
      %c4 = arith.constant 4 : index
      %c0_18 = arith.constant 0 : index
      %42 = vector.load %arg6[%c4, %c0_18] : memref<8x128xf32, #tpu.memory_space<vmem>>, vector<1x128xf32>
      tpu.vector_store %arg6[%c4, %c0_18], %34 {strides = array<i32>} : memref<8x128xf32, #tpu.memory_space<vmem>>, vector<1x128xf32>,
      %cst_19 = arith.constant 1.000000e+00 : f32
      %43 = vector.broadcast %cst_19 : f32 to vector<1x128xf32>
      %c5 = arith.constant 5 : index
      %c0_20 = arith.constant 0 : index
      %44 = vector.load %arg6[%c5, %c0_20] : memref<8x128xf32, #tpu.memory_space<vmem>>, vector<1x128xf32>
      tpu.vector_store %arg6[%c5, %c0_20], %43 {strides = array<i32>} : memref<8x128xf32, #tpu.memory_space<vmem>>, vector<1x128xf32>,
      %cst_21 = arith.constant 0.000000e+00 : f32
      %45 = vector.broadcast %cst_21 : f32 to vector<2x128xf32>
      %c6 = arith.constant 6 : index
      %c0_22 = arith.constant 0 : index
      %46 = vector.load %arg6[%c6, %c0_22] : memref<8x128xf32, #tpu.memory_space<vmem>>, vector<2x128xf32>
      tpu.vector_store %arg6[%c6, %c0_22], %45 {strides = array<i32>} : memref<8x128xf32, #tpu.memory_space<vmem>>, vector<2x128xf32>,
    } else {
    }
    %c32_i32 = arith.constant 32 : i32
    %3 = arith.muli %arg1, %c32_i32 : i32
    %c0 = arith.constant 0 : index
    %4 = memref.load %arg2[%c0] : memref<1xi32, #tpu.memory_space<smem>>
    %5 = arith.cmpi slt, %3, %4 : i32
    %6 = arith.extui %5 : i1 to i32
    %c0_i32_1 = arith.constant 0 : i32
    %7 = arith.cmpi ne, %6, %c0_i32_1 : i32
    scf.if %7 {
      %c0_2 = arith.constant 0 : index
      %c0_3 = arith.constant 0 : index
      %8 = vector.load %arg3[%c0_2, %c0_3] : memref<32x8xf32, #tpu.memory_space<vmem>>, vector<32x8xf32>
      %c0_4 = arith.constant 0 : index
      %c0_5 = arith.constant 0 : index
      %9 = vector.load %arg6[%c0_4, %c0_5] : memref<8x128xf32, #tpu.memory_space<vmem>>, vector<8x128xf32>
      %cst = arith.constant dense<0.000000e+00> : vector<32x128xf32>
      %10 = tpu.matmul %8, %9, %cst {dimension_numbers = #tpu.dot_dimension_numbers<[1], [0], [0], [1], [0, 0, 1, 1], [], []>} : vector<32x8xf32>, vector<8x128xf32>, vector<32x128xf32> -> vector<32x128xf32>
      %11 = math.exp %10 : vector<32x128xf32>
      %12 = arith.truncf %11 : vector<32x128xf32> to vector<32x128xbf16>
      %c0_6 = arith.constant 0 : index
      %c0_7 = arith.constant 0 : index
      %13 = vector.load %arg5[%c0_6, %c0_7] : memref<3x128xf32, #tpu.memory_space<vmem>>, vector<3x128xf32>
      %c0_8 = arith.constant 0 : index
      %c0_9 = arith.constant 0 : index
      %14 = vector.load %arg4[%c0_8, %c0_9] : memref<3x32xbf16, #tpu.memory_space<vmem>>, vector<3x32xbf16>
      %cst_10 = arith.constant dense<0.000000e+00> : vector<3x128xf32>
      %15 = tpu.matmul %14, %12, %cst_10 {dimension_numbers = #tpu.dot_dimension_numbers<[1], [0], [0], [1], [0, 0, 1, 1], [], []>} : vector<3x32xbf16>, vector<32x128xbf16>, vector<3x128xf32> -> vector<3x128xf32>
      %16 = arith.addf %13, %15 : vector<3x128xf32>
      %c0_11 = arith.constant 0 : index
      %c0_12 = arith.constant 0 : index
      %17 = vector.load %arg5[%c0_11, %c0_12] : memref<3x128xf32, #tpu.memory_space<vmem>>, vector<3x128xf32>
      tpu.vector_store %arg5[%c0_11, %c0_12], %16 {strides = array<i32>} : memref<3x128xf32, #tpu.memory_space<vmem>>, vector<3x128xf32>,
    } else {
    }
    return
  }
  func.func @transform_0(%arg0: i32, %arg1: i32, %arg2: memref<1xi32, #tpu.memory_space<smem>>) -> (i32, i32) {
    %c0_i32 = arith.constant 0 : i32
    %c0_i32_0 = arith.constant 0 : i32
    return %arg1, %c0_i32 : i32, i32
  }
  func.func @transform_1(%arg0: i32, %arg1: i32, %arg2: memref<1xi32, #tpu.memory_space<smem>>) -> (i32, i32) {
    %c0_i32 = arith.constant 0 : i32
    %c0_i32_0 = arith.constant 0 : i32
    return %c0_i32, %arg1 : i32, i32
  }
  func.func @transform_2(%arg0: i32, %arg1: i32, %arg2: memref<1xi32, #tpu.memory_space<smem>>) -> (i32, i32) {
    %c0_i32 = arith.constant 0 : i32
    %c0_i32_0 = arith.constant 0 : i32
    return %c0_i32, %arg0 : i32, i32
  }
}

</mosaic_0001>

<bundles_post_ra>
// kernel: tpu_custom_call.1
= control target key start
LH: loop header
LB: loop body
LE: loop exit
PB: predicated region body
PF: predicated region fallthrough
CT: control target
= control target key end

     0   :  { %s821_s0 = inlined_call_operand.<no memory space> [shape: s32[1], index: 0, kind: input, shape index: {}]   ;;  %s822_s1 = inlined_call_operand.vmem [shape: f32[32,8], index: 1, kind: input, shape index: {}]   ;;  %s823_s2 = inlined_call_operand.vmem [shape: bf16[3,32], index: 2, kind: input, shape index: {}]   ;;  %s824_s3 = inlined_call_operand.hbm [shape: f32[3,256], index: 3, kind: output, shape index: {}]  }
   0x1   :  { %8 = sst [smem:[#allocation4]] %s821_s0 }
   0x2   :  { %9 = vsyncpa [#allocation6], 0 }
   0x3   :  { %11 = vsyncpa [#allocation6 + $0x1], 0  ;;  %s694_s14 = smov 0   ;;  %s696_s15 = smov 0  }
   0x4   :  { %s698_s16 = smov 0   ;;  %s700_s17 = smov 0  }
   0x5   :  { %s702_s18 = smov 0   ;;  %s704_s19 = smov 0  }
   0x6 LB: > { %s474_s0 = sadd.s32 4294967295, %s664_s19   ;;  %s475_s20 = sadd.s32 4294967294, %s664_s19   ;;  %s664_s19 = sphi %s704_s19, %s17_s19   ;;  %s660_s18 = sphi %s702_s18, %s831_s18   ;;  %s656_s17 = sphi %s700_s17, %s830_s17   ;;  %s652_s16 = sphi %s698_s16, %s829_s16   ;;  %s648_s15 = sphi %s696_s15, %s828_s15   ;;  %s644_s14 = sphi %s694_s14, %s827_s14  }
   0x7   : > { %s29_s21 = sadd.s32 1, %s660_s18  ;;  %s88_s22 = sadd.s32 1, %s652_s16 }
   0x8   : > { %p31_p0 = scmp.ge.s32.totalorder %s29_s21, 2  ;;  %p98_p1 = scmp.ne.s32.totalorder %s652_s16, %s648_s15 }
   0x9   : > { %p99_p2 = scmp.eq.s32.totalorder %s474_s0, 1  ;;  %p104_p3 = scmp.ne.s32.totalorder %s648_s15, %s644_s14 }
   0xa   : > { %s833_s21 = smov (%p31_p0, %s29_s21), 0  ;;  %p105_p5 = scmp.eq.s32.totalorder %s475_s20, 1 }
   0xb   : > { %p734_p4 = por %p99_p2, %p98_p1  ;;  %s85_s24 = ssub.s32 %s660_s18, %s833_s21 }
   0xc   : > { %p479_p6 = scmp.ge.s32.totalorder %s664_s19, 1  ;;  %p86_p7 = scmp.eq.s32.totalorder %s85_s24, 0 }
   0xd   : > { %p741_p8 = por %p105_p5, %p104_p3  ;;  %p139_p9 = scmp.lt.s32.totalorder %s664_s19, 3 }
   0xe   : > { %s747_s26 = scalar_select %p86_p7, %s652_s16, %s88_s22  }
   0xf   : > { %p140_p10 = pnand %p479_p6, %p139_p9 }
  0x10   : > { %s162_s27 = sand.u32 (!%p140_p10), 1, %s648_s15   ;;  %v181_v0 = vlaneseq (!%p140_p10)  ;;  %s481_s28 = sshll.u32 (!%p140_p10), %s656_s17, 7  ;;  %v666_v1 = vmov (!%p140_p10), 0.0   ;;  %v667_v3 = vmov (!%p140_p10), 1.0  }
  0x11   : > { %143 = sbr.rel (%p140_p10) target bundleno = 526 (0x20e), region = 28  ;;  %s480_s29 = sshll.u32 (!%p140_p10), %s162_s27, 2  ;;  %207 = vst [vmem:[#allocation2 + $0x6] sm:$0x3] (!%p140_p10), %v666_v1  ;;  %v184_v2 = vstv (!%p140_p10), %s481_s28  ;;  %206 = vst [vmem:[#allocation2 + $0x5] sm:$0x1] (!%p140_p10), %v667_v3 }
  0x12   : > { %s209_s30 = sld [smem:[#allocation4]] (!%p140_p10)  ;;  %v182_v4 = vand.u32 (!%p140_p10), 127, %v181_v0  ;;  %s753_s4 = scalar_lea.vmem (!%p140_p10), [#allocation5], %s480_s29 }
  0x13   : > { %180 = vst [vmem:[%s753_s4] sm:$0x7] (!%p140_p10), %v666_v1 }
  0x14   : > { %v185_v5 = vadd.s32 (!%p140_p10), %v184_v2, %v182_v4 }
  0x16   : > { %v186_v6 = vcvt.s32.f32 (!%p140_p10), %v185_v5 }
  0x18   : > { %v187_v7 = vadd.f32 0.5, %v186_v6  ;;  %p485_p11 = scmp.le.s32.totalorder %s209_s30, 0 }
  0x19   : > { %v214_v22 = vld [vmem:[%s822_s1] sm:$0xff] (!%p485_p11)  ;;  %vm219_vm0 = vcmask (!%p485_p11), 64512   ;;  %v215_v23 = vld [vmem:[%s822_s1 + $0x8] sm:$0xff] (!%p485_p11)  ;;  %v216_v24 = vld [vmem:[%s822_s1 + $0x10] sm:$0xff] (!%p485_p11)  ;;  %v668_v26 = vmov (!%p485_p11), 0.0   ;;  %vm669_vm1 = vmmov (!%p485_p11), 0  }
  0x1a   : > { %v188_v8 = vmul.f32 0.0625, %v187_v7  ;;  %505 = vmatprep.mubr.msk.f32.mxu0 (!%p485_p11), %vm219_vm0, %v214_v22  ;;  %v217_v25 = vld [vmem:[%s822_s1 + $0x18] sm:$0xff] (!%p485_p11)  ;;  %511 = vmatprep.subr.bf16.mxu1 (!%p485_p11), %v668_v26  ;;  %v328_v41 = vld [vmem:[%s823_s2] sm:$0x3] (!%p485_p11)  ;;  %vm329_vm2 = vcmask (!%p485_p11), 261120  }
  0x1b   : > { %515 = vmatprep.mubr.msk.bf16.mxu1 (!%p485_p11), %vm669_vm1, %v668_v26  ;;  %v327_v42 = vld [vmem:[%s753_s4] sm:$0x7] (!%p485_p11) }
  0x1c   : > { %v189_v9 = vfloor.f32 %v188_v8 }
  0x1e   : > { %v190_v10 = vmul.f32 16.0, %v189_v9  ;;  %v195_v11 = vadd.f32 0.5, %v189_v9 }
  0x20   : > { %v191_v12 = vsub.f32 %v186_v6, %v190_v10  ;;  %v196_v13 = vmul.f32 0.0625, %v195_v11 }
  0x22   : > { %v192_v14 = vadd.f32 0.5, %v191_v12  ;;  %v483_v15 = vadd.f32 -0.5, %v196_v13 }
  0x24   : > { %v193_v16 = vmul.f32 0.0625, %v192_v14  ;;  %205 = vst [vmem:[#allocation2 + $0x4] sm:$0x1] %v483_v15  ;;  %v202_v17 = vmul.f32 %v483_v15, %v483_v15  ;;  %213 = sbr.rel (%p485_p11) target bundleno = 502 (0x1f6), region = 36 }
  0x26   : > { %v482_v18 = vadd.f32 -0.5, %v193_v16  ;;  %203 = vst [vmem:[#allocation2 + $0x2] sm:$0x1] %v202_v17 }
  0x28   : > { %v198_v19 = vmul.f32 %v482_v18, %v482_v18  ;;  %204 = vst [vmem:[#allocation2 + $0x3] sm:$0x1] %v482_v18  ;;  %v200_v20 = vmul.f32 %v483_v15, %v482_v18 }
  0x2a   : > { %199 = vst [vmem:[#allocation2] sm:$0x1] %v198_v19  ;;  %201 = vst [vmem:[#allocation2 + $0x1] sm:$0x1] %v200_v20 }
  0x31   : > { %v218_v21 = vld [vmem:[#allocation2] sm:$0xff] }
  0x32   : > { %503 = vmatprep.subr.mxu0 %v218_v21 }
  0x33   : > { %504 = vmatpush3.msra.mxu0 %v218_v21 }
  0x34   : > { %506 = vmatmul.mubr.msk.f32.vlgmr.msra.gmra.mrb[0].mxu0 %vm219_vm0, %v215_v23 }
  0x35   : > { %508 = vmatprep.mubr.msk.f32.mxu0 %vm219_vm0, %v216_v24 }
  0x38   : > { %509 = vmatmul.mubr.msk.f32.gmra.mrb[2].mxu0 %vm219_vm0, %v217_v25 }
 0x107   : > { %v507_v27 = vpop.f32.mrb[0].mxu0 }
 0x108   : > { %v319_v28 = vmul.f32 1.442695, %v507_v27  ;;  %v298_v29 = vpop.f32.mrb[1].mxu0 }
 0x109   : > { %v317_v30 = vmul.f32 1.442695, %v298_v29 }
 0x10a   : > { %578 = vpow2.f32 %v319_v28 }
 0x10b   : > { %580 = vpow2.f32 %v317_v30  ;;  %v510_v31 = vpop.f32.mrb[2].mxu0 }
 0x10c   : > { %v323_v32 = vmul.f32 1.442695, %v510_v31  ;;  %v308_v33 = vpop.f32.mrb[3].mxu0 }
 0x10d   : > { %v321_v34 = vmul.f32 1.442695, %v308_v33 }
 0x10e   : > { %582 = vpow2.f32 %v323_v32 }
 0x10f   : > { %584 = vpow2.f32 %v321_v34 }
 0x114   : > { %v579_v35 = vpop.eup %578 }
 0x115   : > { %v581_v36 = vpop.eup %580 }
 0x116   : > { %v325_v37 = vpack.c.bf16 %v579_v35, %v581_v36 }
 0x118   : > { %v583_v38 = vpop.eup %582  ;;  %512 = vmatpush3.bf16.msra.mxu1 %v325_v37 }
 0x119   : > { %v585_v39 = vpop.eup %584  ;;  %513 = vmatprep.subr.bf16.mxu1 %v668_v26 }
 0x11a   : > { %v326_v40 = vpack.c.bf16 %v583_v38, %v585_v39 }
 0x11c   : > { %514 = vmatpush3.bf16.msra.mxu1 %v326_v40 }
 0x11f   : > { %516 = vmatmul.mubr.msk.bf16.vlgmr.msra.gmra.mrb[0].mxu1 %vm329_vm2, %v328_v41 }
 0x1f2   : > { %v367_v43 = vpop.f32.mrb[0].mxu1 }
 0x1f3   : > { %v373_v44 = vadd.f32 %v367_v43, %v327_v42  ;;  %v517_v45 = vpop.f32.mrb[1].mxu1 }
 0x1f4   : > { %v370_v46 = vpop.f32.mrb[2].mxu1 }
 0x1f5   : > { %374 = vst [vmem:[%s753_s4] sm:$0x7] %v373_v44  ;;  %v518_v47 = vpop.f32.mrb[3].mxu1 }
 0x1f6 PF: > { %s492_s20 = sshll.u32 %s656_s17, 6  ;;  %s389_s29 = sshll.u32 %s753_s4, 4  ;;  %s390_s29 = int_to_ptr.vmem [resolvable:$true] %s389_s29 }
 0x1f7   : > { %s777_s28 = scalar_lea.hbm %s824_s3, %s492_s20  ;;  %s376_s30 = scalar_lea.sflag [#allocation6], %s162_s27 }
 0x1f8   : > { %s586_s5 = scalar_lea.vmem %s390_s29, 64  ;;  %s670_s6 = smov [#allocation5]  }
 0x1f9   : > { %p587_p12 = scmp.ne.s32.totalorder %s390_s29, %s586_s5  ;;  %s590_s7 = sshll.u32 %s670_s6, 4  ;;  %s591_s7 = int_to_ptr.vmem [resolvable:$false] %s590_s7 }
 0x1fa   : > { %s592_s8 = scalar_lea.vmem %s591_s7, 128  ;;  %p593_p1 = scmp.lt.s32.totalorder %s390_s29, %s591_s7 }
 0x1fb   : > { %p588_p13 = pnand %p587_p12, %p734_p4  ;;  %p594_p2 = scmp.lt.s32.totalorder %s592_s8, %s586_s5 }
 0x1fd   : > { %p589_p0 = pneg %p588_p13  ;;  %p595_p3 = por %p594_p2, %p593_p1 }
 0x1ff   : > { %p596_p5 = pnand %p595_p3, %p589_p0 }
 0x201   : > { %599 = shalt.err (!%p596_p5)
}
 0x202   : > { %s600_s17 = scalar_lea.hbm %s777_s28, 64  ;;  %s604_s9 = scalar_lea.hbm %s824_s3, 128 }
 0x203   : > { %p601_p6 = scmp.ne.s32.totalorder %s777_s28, %s600_s17  ;;  %p605_p10 = scmp.lt.u32.totalorder %s777_s28, %s824_s3 }
 0x204   : > { %p606_p11 = scmp.lt.u32.totalorder %s604_s9, %s600_s17  ;;  %p608_p13 = scmp.lt.u32.totalorder %s600_s17, %s777_s28 }
 0x205   : > { %p602_p7 = pnand %p601_p6, %p734_p4 }
 0x206   : > { %p607_p12 = por %p606_p11, %p605_p10 }
 0x207   : > { %p603_p9 = pneg %p602_p7 }
 0x208   : > { %p609_p0 = por %p608_p13, %p607_p12 }
 0x20a   : > { %p610_p1 = pnand %p609_p0, %p603_p9 }
 0x20c   : > { %613 = shalt.err (!%p610_p1)
}
 0x20d   : > { %519 = dma.vmem_to_hbm [thread:$0]  (%p734_p4), %s390_s29, 64, %s777_s28, %s376_s30  }
 0x20e PF: > { %p525_p2 = scmp.ge.s32.totalorder %s664_s19, 2  ;;  %s401_s12 = sand.u32 1, %s644_s14  }
 0x20f   : > { %s402_s13 = scalar_lea.sflag [#allocation6], %s401_s12 }
 0x210   : > { %p522_p3 = pnand %p525_p2, %p741_p8 }
 0x212   : > { %639 = dma.done.wait (!%p522_p3), %s402_s13, 64  }
 0x213   : > { %641 = vsyncadd (!%p522_p3), %s402_s13, 4294967232  ;;  %s17_s19 = sadd.s32 1, %s664_s19   ;;  %s827_s14 = smov %s648_s15 }
 0x214   : > { %p14_p5 = scmp.ge.s32.totalorder %s17_s19, 4   ;;  %s828_s15 = smov %s652_s16 }
 0x215   : > { %s829_s16 = smov %s747_s26  ;;  %s830_s17 = smov %s660_s18 }
 0x216   : > { %s831_s18 = smov %s833_s21  ;;  %16 = sbr.rel (!%p14_p5) target bundleno = 6 (0x6), region = 74 }
 0x21d   :  { %407 = vsyncpa [#allocation6], 1 }
 0x21e   :  { %409 = vsyncpa [#allocation6 + $0x1], 1 }

</bundles_post_ra>
